<compile_context>
chip_gen: v7x
topology: tpu7x:2x2x1
jax: 0.10.0
libtpu: 0.0.40
codegen_flags: <defaults>
</compile_context>

<pallas_src>
import jax
import jax.numpy as jnp
from jax import lax
from jax.experimental import pallas as pl
from jax.experimental.pallas import tpu as pltpu

# ----------------------------- static module config -----------------------------
IN_CHANNELS = 4
NUM_FILTERS = (8, 8)          # two convolutions in the main stream
FILTER_LENGTHS = (3, 3)
DILATIONS = (1, 1)
SUBSAMPLE_LENGTH = 2          # > 1 -> max-pool subsample + conv shortcut
SUBSAMPLE_KERNEL = 2          # defaults to subsample_length in the PyTorch module
BATCH = 2
SEQ_LEN = 256                 # multiple of 256 -> L_out = 128 (lane-dense output block)
BN_EPS = 1e-5

C_IN = IN_CHANNELS
C1, C2 = NUM_FILTERS
K0, K1 = FILTER_LENGTHS
D0, D1 = DILATIONS
ROWS = max(C_IN, C1, C2)                                     # sublane rows of the params slab
PAD = max(d * (k - 1) // 2 for k, d in zip(FILTER_LENGTHS, DILATIONS))  # scratch halo width

# Column layout of the packed params slab (one DMA instead of eight tiny ones).
O_DW0 = 0                      # (C_IN, K0) depthwise taps, conv 0
O_PW0 = O_DW0 + K0             # (C1, C_IN) pointwise (BN-scaled), conv 0
O_DW1 = O_PW0 + C_IN           # (C1, K1)   depthwise taps, conv 1
O_PW1 = O_DW1 + K1             # (C2, C1)   pointwise (BN-scaled), conv 1
O_SCW = O_PW1 + C1             # (C2, C_IN) shortcut 1x1 (BN-scaled)
O_B0 = O_SCW + C_IN            # (C1, 1) folded bias, conv 0
O_B1 = O_B0 + 1                # (C2, 1) folded bias, conv 1
O_SCB = O_B1 + 1               # (C2, 1) folded shortcut shift
N_COLS = O_SCB + 1


# --------------------------------- Pallas kernel ---------------------------------
def _depthwise_taps(buf, rows, length, w_rk, k, dil):
    """Depthwise 1D conv (stride 1, 'same' zero padding) on the VPU.

    The activation lives in buf[0:rows, PAD:PAD+length]; buf's halo columns are zero,
    which realizes the 'same' zero padding.  Each tap is a static-offset window load
    plus a broadcasted multiply-add -- no MXU work, no (L, L) constants.
    """
    pad = dil * (k - 1) // 2
    acc = None
    for j in range(k):
        start = PAD - pad + j * dil
        tap = buf[0:rows, start:start + length] * w_rk[:, j:j + 1]
        acc = tap if acc is None else acc + tap
    return acc


def xception_multiconv_kernel(x_ref, p_ref, sel_ref, o_ref, buf):
    L = x_ref.shape[-1]

    # Unpack the packed params slab (tiny static slices of a VMEM-resident constant).
    dw0 = p_ref[0:C_IN, O_DW0:O_DW0 + K0]
    pw0 = p_ref[0:C1, O_PW0:O_PW0 + C_IN]
    dw1 = p_ref[0:C1, O_DW1:O_DW1 + K1]
    pw1 = p_ref[0:C2, O_PW1:O_PW1 + C1]
    scw = p_ref[0:C2, O_SCW:O_SCW + C_IN]
    b0 = p_ref[0:C1, O_B0:O_B0 + 1]
    b1 = p_ref[0:C2, O_B1:O_B1 + 1]
    scb = p_ref[0:C2, O_SCB:O_SCB + 1]

    # Zero the scratch once per step: its halo columns provide the convs' zero padding
    # and a finite fill for the max-pool's shifted read.
    buf[...] = jnp.zeros_like(buf)

    x = x_ref[...]                                    # (C_IN, L)

    # ---- main-stream block 0: ReLU -> depthwise -> pointwise (dw/pw bias + BN folded)
    buf[0:C_IN, PAD:PAD + L] = jnp.maximum(x, 0.0)
    h = _depthwise_taps(buf, C_IN, L, dw0, K0, D0)                        # (C_IN, L)
    h = jnp.dot(pw0, h, preferred_element_type=jnp.float32) + b0          # (C1, L)

    # ---- main-stream block 1
    buf[0:C1, PAD:PAD + L] = jnp.maximum(h, 0.0)
    h = _depthwise_taps(buf, C1, L, dw1, K1, D1)                          # (C1, L)
    h = jnp.dot(pw1, h, preferred_element_type=jnp.float32) + b1          # (C2, L)

    # ---- MaxPool1d(kernel=2, stride=2, pad=0): hmax[t] = max_w h[t+w]; only even t
    #      survive the compaction below, so the zero fill at t = L-1+w is never selected.
    buf[0:C2, PAD:PAD + L] = h
    hmax = h
    for w in range(1, SUBSAMPLE_KERNEL):
        hmax = jnp.maximum(hmax, buf[0:C2, PAD + w:PAD + w + L])

    # ---- shortcut: 1x1 conv (BN folded) at full length; the stride is applied by the
    #      shared compaction, so no separate downsample matmul/constant is needed.
    res = jnp.dot(scw, x, preferred_element_type=jnp.float32) + scb       # (C2, L)

    # ---- single even-lane compaction + residual add: out[:, t] = (res + hmax)[:, 2t]
    o_ref[...] = jnp.dot(res + hmax, sel_ref[...],
                         preferred_element_type=jnp.float32).astype(o_ref.dtype)


# ------------------------------- host-side wrapper -------------------------------
def _fold_bn(gamma, beta, mean, var):
    scale = gamma / jnp.sqrt(var + BN_EPS)
    shift = beta - mean * scale
    return scale, shift


def _pack_params(blocks, shortcut):
    """Fold dw-bias + pw-bias + BatchNorm into the pointwise weights and pack every
    folded weight/bias into one (ROWS, N_COLS) slab (single DMA)."""
    def padded(mat):
        mat = mat.astype(jnp.float32)
        out = jnp.zeros((ROWS, mat.shape[1]), jnp.float32)
        return out.at[:mat.shape[0], :].set(mat)

    p0, p1 = blocks
    s0, t0 = _fold_bn(p0["gamma"], p0["beta"], p0["mean"], p0["var"])
    s1, t1 = _fold_bn(p1["gamma"], p1["beta"], p1["mean"], p1["var"])
    pw0 = p0["pw_w"][:, :, 0].astype(jnp.float32)
    pw1 = p1["pw_w"][:, :, 0].astype(jnp.float32)
    b0 = s0 * (p0["pw_b"] + pw0 @ p0["dw_b"]) + t0
    b1 = s1 * (p1["pw_b"] + pw1 @ p1["dw_b"]) + t1
    ssc, tsc = _fold_bn(shortcut["gamma"], shortcut["beta"],
                        shortcut["mean"], shortcut["var"])
    scw = shortcut["w"][:, :, 0].astype(jnp.float32) * ssc[:, None]

    cols = [
        padded(p0["dw_w"][:, 0, :]),        # O_DW0
        padded(pw0 * s0[:, None]),          # O_PW0
        padded(p1["dw_w"][:, 0, :]),        # O_DW1
        padded(pw1 * s1[:, None]),          # O_PW1
        padded(scw),                        # O_SCW
        padded(b0[:, None]),                # O_B0
        padded(b1[:, None]),                # O_B1
        padded(tsc[:, None]),               # O_SCB
    ]
    params = jnp.concatenate(cols, axis=1)
    assert params.shape == (ROWS, N_COLS)
    return params


def xception_multiconv_forward(x_ncl, blocks, shortcut):
    """x_ncl: (B, C_in, L) float32 -> (B, C_out, L_out) float32."""
    B, c_in, L = x_ncl.shape
    assert c_in == IN_CHANNELS
    # Load-bearing asserts: the even-lane compaction + zero-filled pool shift are only
    # equivalent to MaxPool1d when kernel == stride == 2 divides L and the pool padding
    # is 0 (PyTorch pads MaxPool with -inf, not 0).
    assert SUBSAMPLE_KERNEL == SUBSAMPLE_LENGTH == 2 and L % SUBSAMPLE_LENGTH == 0
    assert (SUBSAMPLE_KERNEL - 1) // 2 == 0
    L_out = (L - SUBSAMPLE_KERNEL) // SUBSAMPLE_LENGTH + 1

    params = _pack_params(blocks, shortcut)

    # The single even-lane compaction matrix, built once on the host and DMA'd
    # (never re-generated per grid step).
    row_ids = jnp.arange(L, dtype=jnp.int32)[:, None]
    col_ids = jnp.arange(L_out, dtype=jnp.int32)[None, :]
    sel = (row_ids == SUBSAMPLE_LENGTH * col_ids).astype(jnp.float32)    # (L, L_out)

    out = pl.pallas_call(
        xception_multiconv_kernel,
        out_shape=jax.ShapeDtypeStruct((B, C2, L_out), jnp.float32),
        grid=(B,),
        in_specs=[
            # per-batch activation tile (batch dim squeezed out of the kernel ref)
            pl.BlockSpec((None, C_IN, L), lambda b: (b, 0, 0)),
            # weights shared across the batch grid axis (constant block index)
            pl.BlockSpec((ROWS, N_COLS), lambda b: (0, 0)),
            pl.BlockSpec((L, L_out), lambda b: (0, 0)),
        ],
        out_specs=pl.BlockSpec((None, C2, L_out), lambda b: (b, 0, 0)),
        scratch_shapes=[pltpu.VMEM((ROWS, L + 2 * PAD), jnp.float32)],
        compiler_params=pltpu.CompilerParams(
            dimension_semantics=("parallel",),   # v7x: split batch over the 2 TCs
        ),
    )(x_ncl.astype(jnp.float32), params, sel)
    return out


# ---------------------------- deterministic parameters ----------------------------
def init_params(key):
    keys = iter(jax.random.split(key, 64))
    blocks = []
    c_in = IN_CHANNELS
    for c_out, k, d in zip(NUM_FILTERS, FILTER_LENGTHS, DILATIONS):
        blocks.append(dict(
            k=k, dil=d,
            dw_w=jax.random.normal(next(keys), (c_in, 1, k), jnp.float32) / k,
            dw_b=0.1 * jax.random.normal(next(keys), (c_in,), jnp.float32),
            pw_w=jax.random.normal(next(keys), (c_out, c_in, 1), jnp.float32) / jnp.sqrt(c_in),
            pw_b=0.1 * jax.random.normal(next(keys), (c_out,), jnp.float32),
            gamma=1.0 + 0.1 * jax.random.normal(next(keys), (c_out,), jnp.float32),
            beta=0.1 * jax.random.normal(next(keys), (c_out,), jnp.float32),
            mean=0.1 * jax.random.normal(next(keys), (c_out,), jnp.float32),
            var=jax.random.uniform(next(keys), (c_out,), jnp.float32, 0.5, 1.5),
        ))
        c_in = c_out
    c_out = NUM_FILTERS[-1]
    shortcut = dict(
        w=0.5 * jax.random.normal(next(keys), (c_out, IN_CHANNELS, 1), jnp.float32),
        gamma=1.0 + 0.1 * jax.random.normal(next(keys), (c_out,), jnp.float32),
        beta=0.1 * jax.random.normal(next(keys), (c_out,), jnp.float32),
        mean=0.1 * jax.random.normal(next(keys), (c_out,), jnp.float32),
        var=jax.random.uniform(next(keys), (c_out,), jnp.float32, 0.5, 1.5),
    )
    return blocks, shortcut


# ------------------------------- pure-JAX reference -------------------------------
def reference(x_ncl, blocks, shortcut):
    dn = ("NCH", "OIH", "NCH")
    h = x_ncl
    for p in blocks:
        c = h.shape[1]
        pad = p["dil"] * (p["k"] - 1) // 2
        h = jnp.maximum(h, 0.0)
        h = lax.conv_general_dilated(h, p["dw_w"], (1,), [(pad, pad)],
                                     rhs_dilation=(p["dil"],),
                                     dimension_numbers=dn, feature_group_count=c)
        h = h + p["dw_b"][None, :, None]
        h = lax.conv_general_dilated(h, p["pw_w"], (1,), [(0, 0)], dimension_numbers=dn)
        h = h + p["pw_b"][None, :, None]
        scale, shift = _fold_bn(p["gamma"], p["beta"], p["mean"], p["var"])
        h = h * scale[None, :, None] + shift[None, :, None]
    B, C, L = h.shape
    pooled = jnp.max(h.reshape(B, C, L // SUBSAMPLE_LENGTH, SUBSAMPLE_LENGTH), axis=-1)
    res = lax.conv_general_dilated(x_ncl, shortcut["w"], (SUBSAMPLE_LENGTH,), [(0, 0)],
                                   dimension_numbers=dn)
    scale, shift = _fold_bn(shortcut["gamma"], shortcut["beta"],
                            shortcut["mean"], shortcut["var"])
    res = res * scale[None, :, None] + shift[None, :, None]
    return pooled + res


# --------------------------------------- main ---------------------------------------
if __name__ == "__main__":
    key = jax.random.PRNGKey(0)
    k_x, k_p = jax.random.split(key)
    x = jax.random.normal(k_x, (BATCH, IN_CHANNELS, SEQ_LEN), jnp.float32)
    blocks, shortcut = init_params(k_p)

    out = xception_multiconv_forward(x, blocks, shortcut)
    out = jax.block_until_ready(out)

    ref = reference(x, blocks, shortcut)
    assert out.shape == ref.shape == (BATCH, NUM_FILTERS[-1], SEQ_LEN // SUBSAMPLE_LENGTH)
    max_err = float(jnp.max(jnp.abs(out - ref)))
    if not bool(jnp.allclose(out, ref, rtol=2e-3, atol=2e-3)):
        raise SystemExit(f"kernel/reference mismatch: max abs err = {max_err}")
    print("KERNEL_OK")
</pallas_src>

<mosaic_0001>
module attributes {stable_mosaic.version = 11 : i64} {
  func.func @xception_multiconv_kernel(%arg0: i32, %arg1: memref<1x4x256xf32, #tpu.memory_space<vmem>>, %arg2: memref<8x25xf32, #tpu.memory_space<vmem>>, %arg3: memref<256x128xf32, #tpu.memory_space<vmem>>, %arg4: memref<1x8x128xf32, #tpu.memory_space<vmem>>, %arg5: memref<8x258xf32, #tpu.memory_space<vmem>>) attributes {dimension_semantics = [#tpu.dimension_semantics<parallel>], iteration_bounds = array<i64: 2>, scalar_prefetch = 0 : i64, scratch_operands = 1 : i64, tpu.core_type = #tpu.core_type<tc>, window_params = [{transform_indices = @transform_0, window_bounds = array<i64: 1, 4, 256>}, {pipeline_mode = #tpu.pipeline_mode<synchronous>, transform_indices = @transform_1, window_bounds = array<i64: 8, 25>}, {pipeline_mode = #tpu.pipeline_mode<synchronous>, transform_indices = @transform_2, window_bounds = array<i64: 256, 128>}, {transform_indices = @transform_3, window_bounds = array<i64: 1, 8, 128>}]} {
    %c0 = arith.constant 0 : index
    %c0_0 = arith.constant 0 : index
    %0 = vector.load %arg2[%c0, %c0_0] : memref<8x25xf32, #tpu.memory_space<vmem>>, vector<4x3xf32>
    %c0_1 = arith.constant 0 : index
    %c3 = arith.constant 3 : index
    %1 = vector.load %arg2[%c0_1, %c3] : memref<8x25xf32, #tpu.memory_space<vmem>>, vector<8x4xf32>
    %c0_2 = arith.constant 0 : index
    %c7 = arith.constant 7 : index
    %2 = vector.load %arg2[%c0_2, %c7] : memref<8x25xf32, #tpu.memory_space<vmem>>, vector<8x3xf32>
    %c0_3 = arith.constant 0 : index
    %c10 = arith.constant 10 : index
    %3 = vector.load %arg2[%c0_3, %c10] : memref<8x25xf32, #tpu.memory_space<vmem>>, vector<8x8xf32>
    %c0_4 = arith.constant 0 : index
    %c18 = arith.constant 18 : index
    %4 = vector.load %arg2[%c0_4, %c18] : memref<8x25xf32, #tpu.memory_space<vmem>>, vector<8x4xf32>
    %c0_5 = arith.constant 0 : index
    %c22 = arith.constant 22 : index
    %5 = vector.load %arg2[%c0_5, %c22] : memref<8x25xf32, #tpu.memory_space<vmem>>, vector<8x1xf32>
    %c0_6 = arith.constant 0 : index
    %c23 = arith.constant 23 : index
    %6 = vector.load %arg2[%c0_6, %c23] : memref<8x25xf32, #tpu.memory_space<vmem>>, vector<8x1xf32>
    %c0_7 = arith.constant 0 : index
    %c24 = arith.constant 24 : index
    %7 = vector.load %arg2[%c0_7, %c24] : memref<8x25xf32, #tpu.memory_space<vmem>>, vector<8x1xf32>
    %cst = arith.constant 0.000000e+00 : f32
    %8 = vector.broadcast %cst : f32 to vector<8x258xf32>
    %c0_8 = arith.constant 0 : index
    %c0_9 = arith.constant 0 : index
    %9 = vector.load %arg5[%c0_8, %c0_9] : memref<8x258xf32, #tpu.memory_space<vmem>>, vector<8x258xf32>
    tpu.vector_store %arg5[%c0_8, %c0_9], %8 {strides = array<i32>} : memref<8x258xf32, #tpu.memory_space<vmem>>, vector<8x258xf32>,
    %c0_10 = arith.constant 0 : index
    %c0_11 = arith.constant 0 : index
    %c0_12 = arith.constant 0 : index
    %10 = vector.load %arg1[%c0_10, %c0_11, %c0_12] : memref<1x4x256xf32, #tpu.memory_space<vmem>>, vector<1x4x256xf32>
    %11 = vector.shape_cast %10 : vector<1x4x256xf32> to vector<4x256xf32>
    %cst_13 = arith.constant 0.000000e+00 : f32
    %12 = vector.broadcast %cst_13 : f32 to vector<4x256xf32>
    %13 = arith.maximumf %11, %12 : vector<4x256xf32>
    %c0_14 = arith.constant 0 : index
    %c1 = arith.constant 1 : index
    %14 = vector.load %arg5[%c0_14, %c1] : memref<8x258xf32, #tpu.memory_space<vmem>>, vector<4x256xf32>
    tpu.vector_store %arg5[%c0_14, %c1], %13 {strides = array<i32>} : memref<8x258xf32, #tpu.memory_space<vmem>>, vector<4x256xf32>,
    %c0_15 = arith.constant 0 : index
    %c0_16 = arith.constant 0 : index
    %15 = vector.load %arg5[%c0_15, %c0_16] : memref<8x258xf32, #tpu.memory_space<vmem>>, vector<4x256xf32>
    %16 = vector.extract_strided_slice %0 {offsets = [0, 0], sizes = [4, 1], strides = [1, 1]} : vector<4x3xf32> to vector<4x1xf32>
    %17 = vector.broadcast %16 : vector<4x1xf32> to vector<4x256xf32>
    %18 = arith.mulf %15, %17 : vector<4x256xf32>
    %c0_17 = arith.constant 0 : index
    %c1_18 = arith.constant 1 : index
    %19 = vector.load %arg5[%c0_17, %c1_18] : memref<8x258xf32, #tpu.memory_space<vmem>>, vector<4x256xf32>
    %20 = vector.extract_strided_slice %0 {offsets = [0, 1], sizes = [4, 1], strides = [1, 1]} : vector<4x3xf32> to vector<4x1xf32>
    %21 = vector.broadcast %20 : vector<4x1xf32> to vector<4x256xf32>
    %22 = arith.mulf %19, %21 : vector<4x256xf32>
    %23 = arith.addf %18, %22 : vector<4x256xf32>
    %c0_19 = arith.constant 0 : index
    %c2 = arith.constant 2 : index
    %24 = vector.load %arg5[%c0_19, %c2] : memref<8x258xf32, #tpu.memory_space<vmem>>, vector<4x256xf32>
    %25 = vector.extract_strided_slice %0 {offsets = [0, 2], sizes = [4, 1], strides = [1, 1]} : vector<4x3xf32> to vector<4x1xf32>
    %26 = vector.broadcast %25 : vector<4x1xf32> to vector<4x256xf32>
    %27 = arith.mulf %24, %26 : vector<4x256xf32>
    %28 = arith.addf %23, %27 : vector<4x256xf32>
    %cst_20 = arith.constant dense<0.000000e+00> : vector<8x256xf32>
    %29 = tpu.matmul %1, %28, %cst_20 {dimension_numbers = #tpu.dot_dimension_numbers<[1], [0], [0], [1], [0, 0, 1, 1], [], []>} : vector<8x4xf32>, vector<4x256xf32>, vector<8x256xf32> -> vector<8x256xf32>
    %30 = vector.broadcast %5 : vector<8x1xf32> to vector<8x256xf32>
    %31 = arith.addf %29, %30 : vector<8x256xf32>
    %cst_21 = arith.constant 0.000000e+00 : f32
    %32 = vector.broadcast %cst_21 : f32 to vector<8x256xf32>
    %33 = arith.maximumf %31, %32 : vector<8x256xf32>
    %c0_22 = arith.constant 0 : index
    %c1_23 = arith.constant 1 : index
    %34 = vector.load %arg5[%c0_22, %c1_23] : memref<8x258xf32, #tpu.memory_space<vmem>>, vector<8x256xf32>
    tpu.vector_store %arg5[%c0_22, %c1_23], %33 {strides = array<i32>} : memref<8x258xf32, #tpu.memory_space<vmem>>, vector<8x256xf32>,
    %c0_24 = arith.constant 0 : index
    %c0_25 = arith.constant 0 : index
    %35 = vector.load %arg5[%c0_24, %c0_25] : memref<8x258xf32, #tpu.memory_space<vmem>>, vector<8x256xf32>
    %36 = vector.extract_strided_slice %2 {offsets = [0, 0], sizes = [8, 1], strides = [1, 1]} : vector<8x3xf32> to vector<8x1xf32>
    %37 = vector.broadcast %36 : vector<8x1xf32> to vector<8x256xf32>
    %38 = arith.mulf %35, %37 : vector<8x256xf32>
    %c0_26 = arith.constant 0 : index
    %c1_27 = arith.constant 1 : index
    %39 = vector.load %arg5[%c0_26, %c1_27] : memref<8x258xf32, #tpu.memory_space<vmem>>, vector<8x256xf32>
    %40 = vector.extract_strided_slice %2 {offsets = [0, 1], sizes = [8, 1], strides = [1, 1]} : vector<8x3xf32> to vector<8x1xf32>
    %41 = vector.broadcast %40 : vector<8x1xf32> to vector<8x256xf32>
    %42 = arith.mulf %39, %41 : vector<8x256xf32>
    %43 = arith.addf %38, %42 : vector<8x256xf32>
    %c0_28 = arith.constant 0 : index
    %c2_29 = arith.constant 2 : index
    %44 = vector.load %arg5[%c0_28, %c2_29] : memref<8x258xf32, #tpu.memory_space<vmem>>, vector<8x256xf32>
    %45 = vector.extract_strided_slice %2 {offsets = [0, 2], sizes = [8, 1], strides = [1, 1]} : vector<8x3xf32> to vector<8x1xf32>
    %46 = vector.broadcast %45 : vector<8x1xf32> to vector<8x256xf32>
    %47 = arith.mulf %44, %46 : vector<8x256xf32>
    %48 = arith.addf %43, %47 : vector<8x256xf32>
    %cst_30 = arith.constant dense<0.000000e+00> : vector<8x256xf32>
    %49 = tpu.matmul %3, %48, %cst_30 {dimension_numbers = #tpu.dot_dimension_numbers<[1], [0], [0], [1], [0, 0, 1, 1], [], []>} : vector<8x8xf32>, vector<8x256xf32>, vector<8x256xf32> -> vector<8x256xf32>
    %50 = vector.broadcast %6 : vector<8x1xf32> to vector<8x256xf32>
    %51 = arith.addf %49, %50 : vector<8x256xf32>
    %c0_31 = arith.constant 0 : index
    %c1_32 = arith.constant 1 : index
    %52 = vector.load %arg5[%c0_31, %c1_32] : memref<8x258xf32, #tpu.memory_space<vmem>>, vector<8x256xf32>
    tpu.vector_store %arg5[%c0_31, %c1_32], %51 {strides = array<i32>} : memref<8x258xf32, #tpu.memory_space<vmem>>, vector<8x256xf32>,
    %c0_33 = arith.constant 0 : index
    %c2_34 = arith.constant 2 : index
    %53 = vector.load %arg5[%c0_33, %c2_34] : memref<8x258xf32, #tpu.memory_space<vmem>>, vector<8x256xf32>
    %54 = arith.maximumf %51, %53 : vector<8x256xf32>
    %cst_35 = arith.constant dense<0.000000e+00> : vector<8x256xf32>
    %55 = tpu.matmul %4, %11, %cst_35 {dimension_numbers = #tpu.dot_dimension_numbers<[1], [0], [0], [1], [0, 0, 1, 1], [], []>} : vector<8x4xf32>, vector<4x256xf32>, vector<8x256xf32> -> vector<8x256xf32>
    %56 = vector.broadcast %7 : vector<8x1xf32> to vector<8x256xf32>
    %57 = arith.addf %55, %56 : vector<8x256xf32>
    %58 = arith.addf %57, %54 : vector<8x256xf32>
    %c0_36 = arith.constant 0 : index
    %c0_37 = arith.constant 0 : index
    %59 = vector.load %arg3[%c0_36, %c0_37] : memref<256x128xf32, #tpu.memory_space<vmem>>, vector<256x128xf32>
    %cst_38 = arith.constant dense<0.000000e+00> : vector<8x128xf32>
    %60 = tpu.matmul %58, %59, %cst_38 {dimension_numbers = #tpu.dot_dimension_numbers<[1], [0], [0], [1], [0, 0, 1, 1], [], []>} : vector<8x256xf32>, vector<256x128xf32>, vector<8x128xf32> -> vector<8x128xf32>
    %c0_39 = arith.constant 0 : index
    %c0_40 = arith.constant 0 : index
    %c0_41 = arith.constant 0 : index
    %61 = vector.load %arg4[%c0_39, %c0_40, %c0_41] : memref<1x8x128xf32, #tpu.memory_space<vmem>>, vector<1x8x128xf32>
    %62 = vector.shape_cast %61 : vector<1x8x128xf32> to vector<8x128xf32>
    %63 = vector.shape_cast %60 : vector<8x128xf32> to vector<1x8x128xf32>
    tpu.vector_store %arg4[%c0_39, %c0_40, %c0_41], %63 {strides = array<i32>} : memref<1x8x128xf32, #tpu.memory_space<vmem>>, vector<1x8x128xf32>,
    return
  }
  func.func @transform_0(%arg0: i32) -> (i32, i32, i32) {
    %c0_i32 = arith.constant 0 : i32
    %c0_i32_0 = arith.constant 0 : i32
    %c0_i32_1 = arith.constant 0 : i32
    return %arg0, %c0_i32, %c0_i32_0 : i32, i32, i32
  }
  func.func @transform_1(%arg0: i32) -> (i32, i32) {
    %c0_i32 = arith.constant 0 : i32
    %c0_i32_0 = arith.constant 0 : i32
    %c0_i32_1 = arith.constant 0 : i32
    return %c0_i32, %c0_i32_0 : i32, i32
  }
  func.func @transform_2(%arg0: i32) -> (i32, i32) {
    %c0_i32 = arith.constant 0 : i32
    %c0_i32_0 = arith.constant 0 : i32
    %c0_i32_1 = arith.constant 0 : i32
    return %c0_i32, %c0_i32_0 : i32, i32
  }
  func.func @transform_3(%arg0: i32) -> (i32, i32, i32) {
    %c0_i32 = arith.constant 0 : i32
    %c0_i32_0 = arith.constant 0 : i32
    %c0_i32_1 = arith.constant 0 : i32
    return %arg0, %c0_i32, %c0_i32_0 : i32, i32, i32
  }
}

</mosaic_0001>

<bundles_post_ra>
// kernel: tpu_custom_call.1
= control target key start
LH: loop header
LB: loop body
LE: loop exit
PB: predicated region body
PF: predicated region fallthrough
CT: control target
= control target key end

     0   :  { %8 = vsyncpa [#allocation4], 0  ;;  %s1547_s0 = inlined_call_operand.hbm [shape: f32[2,4,256], index: 0, kind: input, shape index: {}]   ;;  %s1548_s1 = inlined_call_operand.hbm [shape: f32[8,25], index: 1, kind: input, shape index: {}]   ;;  %s1549_s2 = inlined_call_operand.hbm [shape: f32[256,128], index: 2, kind: input, shape index: {}]   ;;  %s1550_s3 = inlined_call_operand.hbm [shape: f32[2,8,128], index: 3, kind: output, shape index: {}]  }
   0x1   :  { %10 = vsyncpa [#allocation4 + $0x1], 0 }
   0x2   :  { %11 = vsyncpa [#allocation7], 0 }
   0x3   :  { %12 = vsyncpa [#allocation5], 0 }
   0x4   :  { %14 = vsyncpa [#allocation5 + $0x1], 0  ;;  %s1246_s12 = smov 0   ;;  %s1248_s13 = smov 0  }
   0x5   :  { %s1250_s14 = smov 0   ;;  %s1252_s15 = smov 0  }
   0x6 LB: > { %s1267_s16 = sadd.s32 4294967295, %s1202_s15   ;;  %s859_s17 = sadd.s32 4294967294, %s1202_s15   ;;  %s1202_s15 = sphi %s1252_s15, %s1570_s15   ;;  %s1198_s14 = sphi %s1250_s14, %s1569_s14   ;;  %s1194_s13 = sphi %s1248_s13, %s1568_s13   ;;  %s1190_s12 = sphi %s1246_s12, %s1567_s12  }
   0x7   : > { %p40_p0 = scmp.ne.s32.totalorder %s1194_s13, %s1190_s12  ;;  %p1551_p1 = scmp.eq.s32.totalorder %s1267_s16, 0 }
   0x8   : > { %p112_p3 = scmp.eq.s32.totalorder %s859_s17, 1  ;;  %p860_p5 = scmp.ge.s32.totalorder %s1202_s15, 1 }
   0x9   : > { %p1276_p4 = por %p1551_p1, %p40_p0  ;;  %p119_p7 = scmp.lt.s32.totalorder %s1202_s15, 3 }
   0xa   : > { %p1281_p6 = por %p112_p3, %p40_p0  ;;  %s1204_s21 = smov [#allocation6]  }
   0xb   : > { %s1554_s18 = scalar_select %p1276_p4, 1, 0 }
   0xc   : > { %s1555_s19 = scalar_select %p1281_p6, 1, 0 }
   0xd   : > { %p1286_p8 = pnand %p860_p5, %p119_p7  ;;  %s132_s22 = sshll.u32 %s1204_s21, 4  ;;  %s133_s22 = int_to_ptr.vmem [resolvable:$true] %s132_s22 }
   0xe   : > { %s1205_s23 = smov [#allocation8]   ;;  %s1046_s28 = scalar_lea.hbm %s1548_s1, 128 }
   0xf   : > { %s1556_s20 = scalar_select %p1286_p8, 1, 0 }
  0x10   : > { %p963_p10 = pneg %p1286_p8  ;;  %s142_s24 = sshll.u32 %s1205_s23, 4  ;;  %s1299_s24 = int_to_ptr.vmem [resolvable:$true] %s142_s24 }
  0x11   : > { %p1047_p12 = scmp.ne.s32.totalorder %s1548_s1, %s1046_s28  ;;  %p1053_p5 = scmp.lt.u32.totalorder %s1046_s28, %s1548_s1 }
  0x12   : > { %p1295_p11 = pnand %p963_p10, %p1551_p1 }
  0x14   : > { %p1048_p13 = pneg %p1295_p11 }
  0x16   : > { %p1049_p0 = pnand %p1048_p13, %p1047_p12 }
  0x18   : > { %p1050_p3 = pneg %p1049_p0 }
  0x1a   : > { %p1055_p7 = pnand %p1053_p5, %p1050_p3 }
  0x1c   : > { %1058 = shalt.err (!%p1055_p7)
}
  0x1d   : > { %s1059_s6 = scalar_lea.vmem %s133_s22, 128  ;;  %p1067_p2 = scmp.lt.s32.totalorder %s133_s22, %s133_s22 }
  0x1e   : > { %p1060_p10 = scmp.ne.s32.totalorder %s133_s22, %s1059_s6  ;;  %p1068_p6 = scmp.lt.s32.totalorder %s1059_s6, %s1059_s6 }
  0x20   : > { %p1062_p9 = pnand %p1060_p10, %p1048_p13  ;;  %p1069_p4 = por %p1068_p6, %p1067_p2 }
  0x22   : > { %p1063_p1 = pneg %p1062_p9 }
  0x24   : > { %p1070_p8 = pnand %p1069_p4, %p1063_p1 }
  0x26   : > { %1073 = shalt.err (!%p1070_p8)
}
  0x27   : > { %966 = dma.hbm_to_vmem [thread:$0]  (!%p1295_p11), %s1548_s1, 128, %s133_s22, [#allocation7]  }
  0x28   : > { %s1074_s11 = scalar_lea.hbm %s1549_s2, 4096 }
  0x29   : > { %p1075_p9 = scmp.ne.s32.totalorder %s1549_s2, %s1074_s11  ;;  %p1081_p4 = scmp.lt.u32.totalorder %s1074_s11, %s1549_s2 }
  0x2b   : > { %p1077_p2 = pnand %p1075_p9, %p1048_p13 }
  0x2d   : > { %p1078_p1 = pneg %p1077_p2 }
  0x2f   : > { %p1083_p6 = pnand %p1081_p4, %p1078_p1 }
  0x31   : > { %1086 = shalt.err (!%p1083_p6)
}
  0x32   : > { %s1087_s22 = scalar_lea.vmem %s1299_s24, 4096  ;;  %p1095_p3 = scmp.lt.s32.totalorder %s1299_s24, %s1299_s24 }
  0x33   : > { %p1088_p8 = scmp.ne.s32.totalorder %s1299_s24, %s1087_s22  ;;  %p1096_p5 = scmp.lt.s32.totalorder %s1087_s22, %s1087_s22 }
  0x35   : > { %p1090_p12 = pnand %p1088_p8, %p1048_p13  ;;  %p1097_p7 = por %p1096_p5, %p1095_p3 }
  0x37   : > { %p1091_p0 = pneg %p1090_p12 }
  0x39   : > { %p1098_p10 = pnand %p1097_p7, %p1091_p0 }
  0x3b   : > { %1101 = shalt.err (!%p1098_p10)
}
  0x3c   : > { %s1206_s27 = smov 128   ;;  %s1207_s28 = smov 8  }
  0x3d   : > { %969 = dma.hbm_to_vmem [thread:$0]  (!%p1295_p11), %s1549_s2, 4096, %s1299_s24, [#allocation7], %s1206_s27, %s1206_s27, %s1207_s28  }
  0x3e   : > { %s1349_s4 = sadd.s32 1, %s1202_s15   ;;  %s27_s5 = sadd.s32 1, %s1198_s14 }
  0x3f   : > { %s24_s6 = ssub.s32 %s1202_s15, %s1349_s4  ;;  %p34_p13 = scmp.ne.s32.totalorder %s1198_s14, %s1194_s13 }
  0x40   : > { %p25_p9 = scmp.eq.s32.totalorder %s24_s6, 0  ;;  %p35_p2 = scmp.eq.s32.totalorder %s1202_s15, 0 }
  0x41   : > { %p1558_p1 = scmp.eq.s32.totalorder %s1267_s16, 1  ;;  %p980_p6 = scmp.lt.s32.totalorder %s1202_s15, 2 }
  0x42   : > { %s1365_s8 = scalar_select %p25_p9, %s1198_s14, %s27_s5  }
  0x43   : > { %p1359_p4 = por %p1558_p1, %p34_p13  ;;  %p36_p8 = por %p35_p2, %p34_p13 }
  0x44   : > { %s156_s25 = sand.u32 1, %s1198_s14   ;;  %s883_s24 = sshll.u32 %s1202_s15, 7 }
  0x45   : > { %s864_s9 = sshll.u32 %s156_s25, 3  ;;  %s1372_s17 = scalar_lea.hbm %s1547_s0, %s883_s24 }
  0x46   : > { %s160_s21 = scalar_lea.vmem [#allocation3], %s864_s9  ;;  %p1376_p11 = pnand %p980_p6, %p36_p8 }
  0x47   : > { %s168_s23 = sshll.u32 %s160_s21, 4  ;;  %s157_s22 = scalar_lea.sflag [#allocation4], %s156_s25  ;;  %s1374_s23 = int_to_ptr.vmem [resolvable:$true] %s168_s23 }
  0x48   : > { %s1102_s27 = scalar_lea.hbm %s1372_s17, 128  ;;  %p1104_p0 = pneg %p1376_p11 }
  0x49   : > { %p1103_p12 = scmp.ne.s32.totalorder %s1372_s17, %s1102_s27  ;;  %s1107_s30 = scalar_lea.hbm %s1547_s0, 256 }
  0x4a   : > { %p1108_p7 = scmp.lt.u32.totalorder %s1372_s17, %s1547_s0  ;;  %p1109_p10 = scmp.lt.u32.totalorder %s1107_s30, %s1102_s27 }
  0x4b   : > { %p1105_p3 = pnand %p1104_p0, %p1103_p12  ;;  %p1111_p9 = scmp.lt.u32.totalorder %s1102_s27, %s1372_s17 }
  0x4c   : > { %p1110_p13 = por %p1109_p10, %p1108_p7 }
  0x4d   : > { %p1106_p5 = pneg %p1105_p3 }
  0x4e   : > { %p1112_p2 = por %p1111_p9, %p1110_p13 }
  0x50   : > { %p1113_p1 = pnand %p1112_p2, %p1106_p5 }
  0x52   : > { %1116 = shalt.err (!%p1113_p1)
}
  0x53   : > { %s1117_s25 = scalar_lea.vmem %s1374_s23, 128  ;;  %s1208_s9 = smov [#allocation3]  }
  0x54   : > { %p1118_p6 = scmp.ne.s32.totalorder %s1374_s23, %s1117_s25  ;;  %s1122_s24 = sshll.u32 %s1208_s9, 4  ;;  %s1123_s24 = int_to_ptr.vmem [resolvable:$false] %s1122_s24 }
  0x55   : > { %s1124_s10 = scalar_lea.vmem %s1123_s24, 256  ;;  %p1125_p3 = scmp.lt.s32.totalorder %s1374_s23, %s1123_s24 }
  0x56   : > { %p1120_p8 = pnand %p1118_p6, %p1104_p0  ;;  %p1126_p7 = scmp.lt.s32.totalorder %s1124_s10, %s1117_s25 }
  0x58   : > { %p1121_p12 = pneg %p1120_p8  ;;  %p1127_p10 = por %p1126_p7, %p1125_p3 }
  0x5a   : > { %p1128_p13 = pnand %p1127_p10, %p1121_p12 }
  0x5c   : > { %1131 = shalt.err (!%p1128_p13)
}
  0x5d   : > { %973 = dma.hbm_to_vmem [thread:$0]  (!%p1376_p11), %s1372_s17, 128, %s1374_s23, %s157_s22  }
  0x5e   : > { %p1561_p5 = scmp.ne.s32.totalorder %s1556_s20, 0 }
  0x5f   : > { %s1408_s11 = sand.u32 (!%p1561_p5), 1, %s1194_s13   ;;  %p1562_p0 = scmp.ne.s32.totalorder (!%p1561_p5), %s1554_s18, 0 }
  0x60   : > { %177 = sbr.rel (%p1561_p5) target bundleno = 1541 (0x605), region = 32  ;;  %s868_s21 = sshll.u32 (!%p1561_p5), %s1408_s11, 3 }
  0x61   : > { %s180_s27 = scalar_lea.sflag (!%p1561_p5), [#allocation4], %s1408_s11  ;;  %s183_s28 = scalar_lea.vmem (!%p1561_p5), [#allocation3], %s868_s21 }
  0x67   : > { %1177 = dma.done.wait (%p1562_p0), %s180_s27, 128  }
  0x68   : > { %1179 = vsyncadd (%p1562_p0), %s180_s27, 4294967168  ;;  %p1563_p11 = scmp.eq.s32.totalorder %s1267_s16, 0 }
  0x6a   : > { %1181 = dma.done.wait (%p1563_p11), [#allocation7], 4224   ;;  %p1564_p9 = pmov %p1563_p11 }
  0x6b   : > { %v1209_v0 = vmov 1   ;;  %v1210_v1 = vmov 0   ;;  %vm218_vm0 = vcmask 15360   ;;  %v1211_v2 = vmov 0.0   ;;  %v214_v3 = vld [vmem:[#allocation6] sm:$0xf] }
  0x6c   : > { %1183 = vsyncadd (%p1564_p9), [#allocation7], 4294963072  ;;  %1036 = vset.pattern.permute.xlu1 %v1209_v0  ;;  %1038 = vset.pattern.permute.xlu0 %v1210_v1  ;;  %216 = vst [vmem:[#allocation2] sm:$0xff] %v1211_v2  ;;  %v1426_v4 = vld [vmem:[%s183_s28] sm:$0xff]  ;;  %s1212_s18 = smov 1   ;;  %v1213_v7 = vmov 2  }
  0x6d   : > { %217 = vst [vmem:[#allocation2 + $0x8] sm:$0xff] %v1211_v2  ;;  %219 = vst.msk [vmem:[#allocation2 + $0x10] sm:$0xff] %vm218_vm0, %v1211_v2  ;;  %377 = vmatprep.mubr.f32.mxu0 %v1211_v2  ;;  %251 = vperm.xlu1 %1036, %v214_v3   ;;  %v221_v5 = vmax.f32 %v1426_v4, 0.0  ;;  %vm233_vm1 = vcmask 1043464   ;;  %vm228_vm2 = vcmask 7168   ;;  %vm236_vm3 = vcmask 3072  }
  0x6e   : > { %s1214_s20 = smov 127   ;;  %s1215_s17 = smov 126   ;;  %v1436_v20 = vld [vmem:[#allocation6] sm:$0xff]  ;;  %v1216_v21 = vmov 22   ;;  %vm266_vm4 = vcmask 1039360   ;;  %vm289_vm5 = vcmask 1031168  }
  0x6f   : > { %224 = vrot.lane.b32.xlu0 %v221_v5, %s1212_s18  ;;  %v223_v6 = vcombine.high %v221_v5, %v221_v5  ;;  %s1217_s23 = smov 125   ;;  %vm306_vm6 = vcmask 1043456   ;;  %vm303_vm7 = vcmask 31744   ;;  %v1218_v44 = vmov 8   ;;  %s1222_s26 = smov 118  }
  0x70   : > { %v1219_v45 = vmov 9   ;;  %v1220_v53 = vmov 7   ;;  %vm396_vm8 = vcmask 1047560   ;;  %v1221_v63 = vmov 23   ;;  %s1223_s22 = smov 110   ;;  %s880_s29 = sshll.u32 %s1267_s16, 7 }
  0x71   : > { %1037 = vset.pattern.permute.xlu1 %v1213_v7  ;;  %vm461_vm9 = vcmask 64512   ;;  %s213_s30 = scalar_lea.vmem [#allocation9], %s868_s21  ;;  %s1503_s9 = scalar_lea.hbm %s1550_s3, %s880_s29 }
  0x72   : > { %274 = vperm.xlu1 %1037, %v214_v3   ;;  %s770_s5 = sshll.u32 %s213_s30, 4  ;;  %s757_s24 = scalar_lea.sflag [#allocation5], %s1408_s11  ;;  %s1505_s5 = int_to_ptr.vmem [resolvable:$true] %s770_s5 }
  0x73   : > { %226 = vrot.lane.b32.xlu0 %v223_v6, %s1212_s18  ;;  %s1132_s10 = scalar_lea.vmem %s1505_s5, 128  ;;  %s1225_s16 = smov [#allocation9]  }
  0x74   : > { %p1133_p2 = scmp.ne.s32.totalorder %s1505_s5, %s1132_s10  ;;  %s1136_s21 = sshll.u32 %s1225_s16, 4  ;;  %s1137_s21 = int_to_ptr.vmem [resolvable:$false] %s1136_s21 }
  0x75   : > { %s1138_s27 = scalar_lea.vmem %s1137_s21, 256  ;;  %p1139_p8 = scmp.lt.s32.totalorder %s1505_s5, %s1137_s21 }
  0x76   : > { %1039 = vset.pattern.permute.xlu1 %v1216_v21  ;;  %p1134_p1 = pnand %p1133_p2, %p1359_p4  ;;  %p1140_p12 = scmp.lt.s32.totalorder %s1138_s27, %s1132_s10 }
  0x77   : > { %242 = vperm.xlu0 %1038, %v214_v3  }
  0x78   : > { %p1135_p6 = pneg %p1134_p1  ;;  %p1141_p3 = por %p1140_p12, %p1139_p8 }
  0x7a   : > { %p1142_p7 = pnand %p1141_p3, %p1135_p6 }
  0x7b   : > { %1040 = vset.pattern.permute.xlu0 %v1218_v44 }
  0xe1   : > { %v225_v8 = vpop.permute.xlu0 %224 }
  0xe2   : > { %234 = vst.msk [vmem:[#allocation2] sm:$0xf] %vm233_vm1, %v225_v8 }
  0xe5   : > { %v227_v9 = vpop.permute.xlu0 %226 }
  0xe6   : > { %v229_v10 = vsel %vm228_vm2, %v225_v8, %v227_v9  ;;  %237 = vst.msk [vmem:[#allocation2 + $0x10] sm:$0xf] %vm236_vm3, %v227_v9 }
  0xe7   : > { %235 = vst [vmem:[#allocation2 + $0x8] sm:$0xf] %v229_v10 }
  0xe9   : > { %v247_v11 = vld [vmem:[#allocation2] sm:$0xf] }
  0xea   : > { %v238_v34 = vld [vmem:[#allocation2] sm:$0xf] }
  0xec   : > { %v252_v12 = vpop.permute.xlu1 %251 }
  0xed   : > { %v254_v13 = vmul.f32 %v252_v12, %v247_v11  ;;  %v249_v16 = vld [vmem:[#allocation2 + $0x10] sm:$0xf] }
  0xee   : > { %v248_v14 = vld [vmem:[#allocation2 + $0x8] sm:$0xf]  ;;  %v256_v19 = vmul.f32 %v252_v12, %v249_v16 }
  0xef   : > { %v255_v15 = vmul.f32 %v252_v12, %v248_v14  ;;  %260 = vrot.lane.b32.xlu0 %v254_v13, %s1214_s20  ;;  %v239_v28 = vld [vmem:[#allocation2 + $0x8] sm:$0xf] }
  0xf1   : > { %262 = vrot.lane.b32.xlu1 %v255_v15, %s1214_s20  ;;  %v275_v17 = vpop.permute.xlu1 %274 }
  0xf2   : > { %v279_v18 = vmul.f32 %v275_v17, %v249_v16  ;;  %v278_v22 = vmul.f32 %v275_v17, %v248_v14  ;;  %v277_v23 = vmul.f32 %v275_v17, %v247_v11 }
  0xf4   : > { %287 = vrot.lane.b32.xlu0 %v279_v18, %s1215_s17 }
  0xf5   : > { %264 = vrot.lane.b32.xlu1 %v256_v19, %s1214_s20 }
  0xf6   : > { %v243_v24 = vpop.permute.xlu0 %242 }
  0xf7   : > { %v246_v30 = vmul.f32 %v243_v24, %v239_v28  ;;  %v245_v37 = vmul.f32 %v243_v24, %v238_v34  ;;  %v653_v34 = vld [vmem:[#allocation8] sm:$0xff] }
  0xf8   : > { %301 = vrot.lane.b32.xlu0 %v1436_v20, %s1217_s23 }
  0xf9   : > { %285 = vrot.lane.b32.xlu1 %v278_v22, %s1215_s17  ;;  %v573_v22 = vcombine.high %v1426_v4, %v1426_v4 }
  0xfd   : > { %283 = vrot.lane.b32.xlu1 %v277_v23, %s1215_s17 }
 0x101   : > { %298 = vperm.xlu1 %1039, %v1436_v20  }
 0x105   : > { %1041 = vset.pattern.permute.xlu1 %v1219_v45  ;;  %v657_v45 = vld [vmem:[#allocation8 + $0x20] sm:$0xff] }
 0x161   : > { %v261_v26 = vpop.permute.xlu0 %260 }
 0x163   : > { %v263_v25 = vpop.permute.xlu1 %262 }
 0x164   : > { %v267_v35 = vsel %vm266_vm4, %v261_v26, %v263_v25 }
 0x165   : > { %v271_v39 = vadd.f32 %v267_v35, %v245_v37  ;;  %v671_v35 = vld [vmem:[#allocation8 + $0x90] sm:$0xff] }
 0x166   : > { %v288_v31 = vpop.permute.xlu0 %287 }
 0x167   : > { %v265_v27 = vpop.permute.xlu1 %264 }
 0x168   : > { %v268_v29 = vsel %vm266_vm4, %v263_v25, %v265_v27  ;;  %v1224_v27 = vmov 24  }
 0x169   : > { %v272_v32 = vadd.f32 %v268_v29, %v246_v30 }
 0x16a   : > { %v302_v43 = vpop.permute.xlu0 %301 }
 0x16b   : > { %v286_v33 = vpop.permute.xlu1 %285 }
 0x16c   : > { %v291_v36 = vsel %vm289_vm5, %v286_v33, %v288_v31 }
 0x16d   : > { %v295_v38 = vadd.f32 %v291_v36, %v272_v32  ;;  %v669_v32 = vld [vmem:[#allocation8 + $0x80] sm:$0xff]  ;;  %v672_v36 = vld [vmem:[#allocation8 + $0x98] sm:$0xff] }
 0x16f   : > { %872 = vmatprep.subr.msk.mxu0 %vm306_vm6, %v295_v38  ;;  %v284_v40 = vpop.permute.xlu1 %283  ;;  %v923_v38 = vpack.c.bf16 %v672_v36, %v671_v35 }
 0x170   : > { %v290_v41 = vsel %vm289_vm5, %v284_v40, %v286_v33  ;;  %v670_v33 = vld [vmem:[#allocation8 + $0x88] sm:$0xff]  ;;  %v656_v40 = vld [vmem:[#allocation8 + $0x18] sm:$0xff] }
 0x171   : > { %v294_v42 = vadd.f32 %v290_v41, %v271_v39  ;;  %v655_v39 = vld [vmem:[#allocation8 + $0x10] sm:$0xff] }
 0x173   : > { %873 = vmatpush1.msk.msra.mxu0 %vm306_vm6, %v294_v42  ;;  %v674_v42 = vld [vmem:[#allocation8 + $0xa8] sm:$0xff] }
 0x174   : > { %874 = vmatmul.mubr.msk.f32.vlgmr.msra.gmra.mrb[0].mxu0 %vm303_vm7, %v302_v43  ;;  %v925_v43 = vpack.c.bf16 %v656_v40, %v655_v39 }
 0x175   : > { %528 = vmatprep.mubr.f32.mxu0 %v1211_v2 }
 0x180   : > { %v299_v46 = vpop.permute.xlu1 %298 }
 0x247   : > { %v379_v47 = vpop.f32.mrb[0].mxu0 }
 0x248   : > { %v380_v48 = vadd.f32 %v379_v47, %v299_v46  ;;  %v381_v49 = vpop.f32.mrb[1].mxu0  ;;  %v675_v47 = vld [vmem:[#allocation8 + $0xb0] sm:$0xff] }
 0x249   : > { %v382_v50 = vadd.f32 %v381_v49, %v299_v46  ;;  %v658_v46 = vld [vmem:[#allocation8 + $0x28] sm:$0xff] }
 0x24a   : > { %v384_v51 = vmax.f32 %v380_v48, 0.0  ;;  %v676_v48 = vld [vmem:[#allocation8 + $0xb8] sm:$0xff]  ;;  %v929_v49 = vpack.c.bf16 %v658_v46, %v657_v45 }
 0x24b   : > { %v385_v52 = vmax.f32 %v382_v50, 0.0  ;;  %v931_v50 = vpack.c.bf16 %v676_v48, %v675_v47 }
 0x24c   : > { %388 = vrot.lane.b32.xlu0 %v384_v51, %s1212_s18  ;;  %v659_v51 = vld [vmem:[#allocation8 + $0x30] sm:$0xff] }
 0x24d   : > { %390 = vrot.lane.b32.xlu1 %v385_v52, %s1212_s18  ;;  %v660_v52 = vld [vmem:[#allocation8 + $0x38] sm:$0xff] }
 0x250   : > { %412 = vperm.xlu0 %1040, %v1436_v20  }
 0x251   : > { %434 = vperm.xlu1 %1041, %v1436_v20  }
 0x254   : > { %1043 = vset.pattern.permute.xlu0 %v1221_v63  ;;  %v663_v63 = vld [vmem:[#allocation8 + $0x50] sm:$0xff] }
 0x255   : > { %1042 = vset.pattern.permute.xlu1 %v1220_v53  ;;  %v677_v53 = vld [vmem:[#allocation8 + $0xc0] sm:$0xff] }
 0x256   : > { %403 = vperm.xlu1 %1042, %v1436_v20  }
 0x2be   : > { %v389_v54 = vpop.permute.xlu0 %388 }
 0x2bf   : > { %397 = vst.msk [vmem:[#allocation2] sm:$0xff] %vm396_vm8, %v389_v54  ;;  %v391_v55 = vpop.permute.xlu1 %390 }
 0x2c0   : > { %399 = vst.msk [vmem:[#allocation2 + $0x10] sm:$0xff] %vm228_vm2, %v391_v55  ;;  %v392_v62 = vsel %vm228_vm2, %v389_v54, %v391_v55  ;;  %v678_v54 = vld [vmem:[#allocation8 + $0xc8] sm:$0xff]  ;;  %v933_v55 = vpack.c.bf16 %v660_v52, %v659_v51 }
 0x2c6   : > { %v408_v56 = vld [vmem:[#allocation2] sm:$0xff] }
 0x2c7   : > { %v410_v57 = vld [vmem:[#allocation2 + $0x10] sm:$0xff] }
 0x2cf   : > { %v413_v58 = vpop.permute.xlu0 %412 }
 0x2d0   : > { %v415_v59 = vmul.f32 %v413_v58, %v408_v56  ;;  %v417_v60 = vmul.f32 %v413_v58, %v410_v57  ;;  %v435_v61 = vpop.permute.xlu1 %434  ;;  %v416_v0 = vmul.f32 %v413_v58, %v392_v62  ;;  %v662_v58 = vld [vmem:[#allocation8 + $0x48] sm:$0xff] }
 0x2d1   : > { %v438_v1 = vmul.f32 %v435_v61, %v392_v62  ;;  %v437_v3 = vmul.f32 %v435_v61, %v408_v56  ;;  %v439_v5 = vmul.f32 %v435_v61, %v410_v57  ;;  %v661_v57 = vld [vmem:[#allocation8 + $0x40] sm:$0xff]  ;;  %v680_v61 = vld [vmem:[#allocation8 + $0xd8] sm:$0xff] }
 0x2d2   : > { %425 = vrot.lane.b32.xlu1 %v417_v60, %s1214_s20  ;;  %421 = vrot.lane.b32.xlu0 %v415_v59, %s1214_s20  ;;  %v937_v59 = vpack.c.bf16 %v662_v58, %v661_v57  ;;  %v679_v60 = vld [vmem:[#allocation8 + $0xd0] sm:$0xff] }
 0x2d5   : > { %v404_v6 = vpop.permute.xlu1 %403 }
 0x2d6   : > { %445 = vrot.lane.b32.xlu1 %v438_v1, %s1215_s17  ;;  %423 = vrot.lane.b32.xlu0 %v416_v0, %s1214_s20  ;;  %v406_v13 = vmul.f32 %v408_v56, %v404_v6  ;;  %v407_v14 = vmul.f32 %v404_v6, %v392_v62  ;;  %v935_v56 = vpack.c.bf16 %v678_v54, %v677_v53  ;;  %v664_v0 = vld [vmem:[#allocation8 + $0x58] sm:$0xff]  ;;  %v682_v6 = vld [vmem:[#allocation8 + $0xe8] sm:$0xff] }
 0x2d7   : > { %v939_v62 = vpack.c.bf16 %v680_v61, %v679_v60  ;;  %v941_v1 = vpack.c.bf16 %v664_v0, %v663_v63 }
 0x2da   : > { %443 = vrot.lane.b32.xlu1 %v437_v3, %s1215_s17  ;;  %447 = vrot.lane.b32.xlu0 %v439_v5, %s1215_s17  ;;  %v681_v5 = vld [vmem:[#allocation8 + $0xe0] sm:$0xff] }
 0x2de   : > { %459 = vrot.lane.b32.xlu0 %v1436_v20, %s1222_s26  ;;  %570 = vrot.lane.b32.xlu1 %v1436_v20, %s1223_s22 }
 0x2e2   : > { %456 = vperm.xlu0 %1043, %v1436_v20  }
 0x2e6   : > { %1044 = vset.pattern.permute.xlu0 %v1224_v27 }
 0x2e7   : > { %567 = vperm.xlu0 %1044, %v1436_v20   ;;  %v673_v20 = vld [vmem:[#allocation8 + $0xa0] sm:$0xff] }
 0x2e8   : > { %v927_v44 = vpack.c.bf16 %v674_v42, %v673_v20 }
 0x344   : > { %v426_v7 = vpop.permute.xlu1 %425  ;;  %v422_v8 = vpop.permute.xlu0 %421 }
 0x348   : > { %v446_v9 = vpop.permute.xlu1 %445  ;;  %v424_v10 = vpop.permute.xlu0 %423 }
 0x349   : > { %v427_v11 = vsel %vm266_vm4, %v422_v8, %v424_v10  ;;  %v428_v12 = vsel %vm266_vm4, %v424_v10, %v426_v7  ;;  %v943_v7 = vpack.c.bf16 %v682_v6, %v681_v5  ;;  %v666_v10 = vld [vmem:[#allocation8 + $0x68] sm:$0xff] }
 0x34a   : > { %v431_v15 = vadd.f32 %v427_v11, %v406_v13  ;;  %v432_v16 = vadd.f32 %v428_v12, %v407_v14  ;;  %v683_v12 = vld [vmem:[#allocation8 + $0xf0] sm:$0xff]  ;;  %v684_v13 = vld [vmem:[#allocation8 + $0xf8] sm:$0xff] }
 0x34c   : > { %v444_v17 = vpop.permute.xlu1 %443  ;;  %v448_v18 = vpop.permute.xlu0 %447 }
 0x34d   : > { %v449_v19 = vsel %vm289_vm5, %v444_v17, %v446_v9  ;;  %v450_v21 = vsel %vm289_vm5, %v446_v9, %v448_v18  ;;  %v665_v9 = vld [vmem:[#allocation8 + $0x60] sm:$0xff]  ;;  %v668_v17 = vld [vmem:[#allocation8 + $0x78] sm:$0xff] }
 0x34e   : > { %v453_v23 = vadd.f32 %v449_v19, %v431_v15  ;;  %v454_v24 = vadd.f32 %v450_v21, %v432_v16  ;;  %v945_v11 = vpack.c.bf16 %v666_v10, %v665_v9  ;;  %v947_v15 = vpack.c.bf16 %v684_v13, %v683_v12  ;;  %v667_v16 = vld [vmem:[#allocation8 + $0x70] sm:$0xff] }
 0x34f   : > { %v949_v18 = vpack.c.bf16 %v668_v17, %v667_v16 }
 0x350   : > { %464 = vmatprep.subr.mxu0 %v454_v24  ;;  %v460_v25 = vpop.permute.xlu0 %459  ;;  %v571_v26 = vpop.permute.xlu1 %570 }
 0x351   : > { %465 = vmatpush1.msra.mxu0 %v453_v23 }
 0x352   : > { %875 = vmatmul.mubr.msk.f32.vlgmr.msra.gmra.mrb[2].mxu0 %vm461_vm9, %v460_v25  ;;  %876 = vmatprep.subr.msk.mxu0 %vm306_vm6, %v573_v22 }
 0x353   : > { %877 = vmatpush1.msk.msra.mxu0 %vm306_vm6, %v1426_v4  ;;  %644 = vmatprep.mubr.f32.mxu0 %v1211_v2  ;;  %v919_v4 = vpack.c.bf16 %v670_v33, %v669_v32  ;;  %v654_v2 = vld [vmem:[#allocation8 + $0x8] sm:$0xff] }
 0x354   : > { %v921_v37 = vpack.c.bf16 %v654_v2, %v653_v34 }
 0x355   : > { %920 = vmatprep.subr.bf16.mxu1 %v919_v4 }
 0x356   : > { %878 = vmatmul.mubr.msk.f32.vlgmr.msra.gmra.mrb[4].mxu0 %vm303_vm7, %v571_v26  ;;  %922 = vmatpush3.bf16.msra.mxu1 %v921_v37 }
 0x357   : > { %924 = vmatprep.subr.bf16.mxu1 %v923_v38 }
 0x35a   : > { %926 = vmatpush3.bf16.msra.mxu1 %v925_v43 }
 0x35b   : > { %928 = vmatprep.subr.bf16.mxu1 %v927_v44 }
 0x35e   : > { %930 = vmatpush3.bf16.msra.mxu1 %v929_v49 }
 0x35f   : > { %932 = vmatprep.subr.bf16.mxu1 %v931_v50 }
 0x361   : > { %v457_v28 = vpop.permute.xlu0 %456 }
 0x362   : > { %934 = vmatpush3.bf16.msra.mxu1 %v933_v55 }
 0x363   : > { %936 = vmatprep.subr.bf16.mxu1 %v935_v56 }
 0x366   : > { %938 = vmatpush3.bf16.msra.mxu1 %v937_v59  ;;  %v568_v24 = vpop.permute.xlu0 %567 }
 0x367   : > { %940 = vmatprep.subr.bf16.mxu1 %v939_v62 }
 0x36a   : > { %942 = vmatpush3.bf16.msra.mxu1 %v941_v1 }
 0x36b   : > { %944 = vmatprep.subr.bf16.mxu1 %v943_v7 }
 0x36e   : > { %946 = vmatpush3.bf16.msra.mxu1 %v945_v11 }
 0x36f   : > { %948 = vmatprep.subr.bf16.mxu1 %v947_v15 }
 0x372   : > { %950 = vmatpush3.bf16.msra.mxu1 %v949_v18 }
 0x425   : > { %v530_v29 = vpop.f32.mrb[2].mxu0 }
 0x426   : > { %v1479_v30 = vadd.f32 %v530_v29, %v457_v28  ;;  %v532_v31 = vpop.f32.mrb[3].mxu0 }
 0x427   : > { %v1483_v41 = vadd.f32 %v532_v31, %v457_v28 }
 0x428   : > { %537 = vrot.lane.b32.xlu1 %v1479_v30, %s1212_s18 }
 0x429   : > { %v646_v3 = vpop.f32.mrb[4].mxu0 }
 0x42a   : > { %v648_v8 = vpop.f32.mrb[5].mxu0  ;;  %v647_v31 = vadd.f32 %v646_v3, %v568_v24 }
 0x42b   : > { %v649_v33 = vadd.f32 %v648_v8, %v568_v24 }
 0x42c   : > { %539 = vrot.lane.b32.xlu1 %v1483_v41, %s1212_s18 }
 0x49a   : > { %v538_v14 = vpop.permute.xlu1 %537 }
 0x49b   : > { %545 = vst.msk [vmem:[#allocation2] sm:$0xff] %vm396_vm8, %v538_v14 }
 0x49e   : > { %v540_v19 = vpop.permute.xlu1 %539 }
 0x49f   : > { %v541_v21 = vsel %vm228_vm2, %v538_v14, %v540_v19  ;;  %547 = vst.msk [vmem:[#allocation2 + $0x10] sm:$0xff] %vm228_vm2, %v540_v19 }
 0x4a0   : > { %546 = vst [vmem:[#allocation2 + $0x8] sm:$0xff] %v541_v21  ;;  %556 = vrot.lane.b32.xlu1 %v541_v21, %s1215_s17 }
 0x4a2   : > { %v548_v22 = vld [vmem:[#allocation2] sm:$0xff] }
 0x4a3   : > { %554 = vrot.lane.b32.xlu0 %v548_v22, %s1215_s17 }
 0x4a6   : > { %v550_v23 = vld [vmem:[#allocation2 + $0x10] sm:$0xff] }
 0x4a7   : > { %558 = vrot.lane.b32.xlu1 %v550_v23, %s1215_s17 }
 0x512   : > { %v557_v26 = vpop.permute.xlu1 %556 }
 0x515   : > { %v555_v25 = vpop.permute.xlu0 %554 }
 0x516   : > { %v560_v27 = vsel %vm289_vm5, %v555_v25, %v557_v26 }
 0x517   : > { %v564_v29 = vmax.f32 %v1479_v30, %v560_v27 }
 0x519   : > { %v559_v28 = vpop.permute.xlu1 %558  ;;  %v651_v2 = vadd.f32 %v647_v31, %v564_v29 }
 0x51a   : > { %v561_v32 = vsel %vm289_vm5, %v557_v26, %v559_v28 }
 0x51b   : > { %v565_v34 = vmax.f32 %v1483_v41, %v561_v32 }
 0x51d   : > { %v652_v4 = vadd.f32 %v649_v33, %v565_v34 }
 0x51f   : > { %749 = vmatprep.mubr.f32.mxu1 %v652_v4 }
 0x520   : > { %750 = vmatmul.mubr.f32.vlgmr.msra.gmra.mrb[0].mxu1 %v651_v2 }
 0x5f3   : > { %v916_v35 = vpop.f32.mrb[0].mxu1 }
 0x5f4   : > { %v917_v36 = vpop.f32.mrb[1].mxu1 }
 0x5f5   : > { %v918_v37 = vadd.f32 %v917_v36, %v916_v35 }
 0x5f7   : > { %755 = vst [vmem:[%s213_s30] sm:$0xff] %v918_v37 }
 0x5f8   : > { %1145 = shalt.err (!%p1142_p7)
}
 0x5f9   : > { %s1146_s11 = scalar_lea.hbm %s1503_s9, 128  ;;  %s1150_s20 = scalar_lea.hbm %s1550_s3, 256 }
 0x5fa   : > { %p1147_p10 = scmp.ne.s32.totalorder %s1503_s9, %s1146_s11  ;;  %p1151_p0 = scmp.lt.u32.totalorder %s1503_s9, %s1550_s3 }
 0x5fb   : > { %p1152_p11 = scmp.lt.u32.totalorder %s1150_s20, %s1146_s11  ;;  %p1154_p2 = scmp.lt.u32.totalorder %s1146_s11, %s1503_s9 }
 0x5fc   : > { %p1148_p13 = pnand %p1147_p10, %p1359_p4 }
 0x5fd   : > { %p1153_p9 = por %p1152_p11, %p1151_p0 }
 0x5fe   : > { %p1149_p5 = pneg %p1148_p13 }
 0x5ff   : > { %p1155_p1 = por %p1154_p2, %p1153_p9 }
 0x601   : > { %p1156_p6 = pnand %p1155_p1, %p1149_p5 }
 0x603   : > { %1159 = shalt.err (!%p1156_p6)
}
 0x604   : > { %961 = dma.vmem_to_hbm [thread:$0]  (%p1359_p4), %s1505_s5, 128, %s1503_s9, %s757_s24  }
 0x605 PF: > { %s782_s26 = sand.u32 1, %s1190_s12   ;;  %p1565_p8 = scmp.ne.s32.totalorder %s1555_s19, 0 }
 0x606   : > { %p1566_p12 = scmp.ge.s32.totalorder %s1202_s15, 2  ;;  %s783_s22 = scalar_lea.sflag [#allocation5], %s782_s26 }
 0x608   : > { %p975_p3 = pnand %p1566_p12, %p1565_p8 }
 0x60a   : > { %1185 = dma.done.wait (!%p975_p3), %s783_s22, 128  }
 0x60b   : > { %1187 = vsyncadd (!%p975_p3), %s783_s22, 4294967168  ;;  %p17_p7 = scmp.ge.s32.totalorder %s1349_s4, 4   ;;  %s1567_s12 = smov %s1194_s13 }
 0x60c   : > { %s1568_s13 = smov %s1198_s14  ;;  %s1569_s14 = smov %s1365_s8 }
 0x60d   : > { %s1570_s15 = smov %s1349_s4  ;;  %19 = sbr.rel (!%p17_p7) target bundleno = 6 (0x6), region = 85 }
 0x614   :  { %788 = vsyncpa [#allocation4], 1 }
 0x615   :  { %790 = vsyncpa [#allocation4 + $0x1], 1 }
 0x616   :  { %791 = vsyncpa [#allocation7], 1 }
 0x617   :  { %792 = vsyncpa [#allocation5], 1 }
 0x618   :  { %794 = vsyncpa [#allocation5 + $0x1], 1 }

</bundles_post_ra>
